<compile_context>
chip_gen: v6e
topology: v6e:2x2x1
jax: 0.10.0
libtpu: 0.0.40
codegen_flags: <defaults>
</compile_context>

<pallas_src>
import jax
import jax.numpy as jnp
import numpy as np
from jax import lax
from jax.experimental import pallas as pl
from jax.experimental.pallas import tpu as pltpu

EPS = 1e-5  # nn.BatchNorm3d default eps


# ----------------------------- Pallas kernel ------------------------------ #
def _fused_bn_relu_conv_kernel(x_ref, scale_ref, shift_ref, w_ref, b_ref,
                               o_ref, *stat_refs):
    # x_ref:       (1, K, T)   activations, channels-first, voxels on lanes
    # scale/shift: (K, 1)      folded BatchNorm scale / shift per input row
    # w_ref:       (Cout, K)   conv expressed as a row contraction
    # b_ref:       (Cout, 1)
    # o_ref:       (1, Cout, T)
    # stat_refs:   optional ((1,1,Cout,1), (1,1,Cout,1)) partial sum / sumsq
    x = x_ref[0]                                            # (K, T)
    h = jnp.maximum(x * scale_ref[...] + shift_ref[...], 0.0)
    w = w_ref[...]                                          # (Cout, K)
    K = h.shape[0]
    # Tiny contraction as broadcast FMAs on the VPU (static unroll, K <= 32).
    acc = b_ref[...] + w[:, 0:1] * h[0:1, :]                # (Cout, T)
    for k in range(1, K):
        acc = acc + w[:, k:k + 1] * h[k:k + 1, :]
    o_ref[0] = acc
    if stat_refs:                                           # BN#2 partial stats
        ssum_ref, ssq_ref = stat_refs
        ssum_ref[0, 0] = jnp.sum(acc, axis=-1, keepdims=True)        # (Cout, 1)
        ssq_ref[0, 0] = jnp.sum(acc * acc, axis=-1, keepdims=True)


def _pick_tile(S, target_lanes):
    """Largest lane tile that divides S exactly: the full axis if small, else
    the biggest multiple of 128 <= target_lanes that divides S (fallback: S)."""
    if S <= target_lanes:
        return S
    t = (target_lanes // 128) * 128
    while t >= 128:
        if S % t == 0:
            return t
        t -= 128
    return S


def fused_bn_relu_conv(x3, scale, shift, w, b, *, with_stats=False,
                       target_lanes=16384):
    """o[n,co,s] = b[co] + sum_k w[co,k] * relu(x3[n,k,s]*scale[k] + shift[k]).

    x3: (N, K, S) f32, scale/shift: (K,), w: (Cout, K), b: (Cout,).
    Returns o (N, Cout, S); if with_stats also per-block channel sum & sumsq.
    """
    N, K, S = x3.shape
    Cout = w.shape[0]
    ts = _pick_tile(S, target_lanes)          # lane-dense, ~0.5-2 MiB per step
    n_s = S // ts

    in_specs = [
        pl.BlockSpec((1, K, ts), lambda n, j: (n, 0, j)),   # activations tile
        pl.BlockSpec((K, 1), lambda n, j: (0, 0)),          # BN scale
        pl.BlockSpec((K, 1), lambda n, j: (0, 0)),          # BN shift
        pl.BlockSpec((Cout, K), lambda n, j: (0, 0)),       # conv weight
        pl.BlockSpec((Cout, 1), lambda n, j: (0, 0)),       # conv bias
    ]
    out_shape = [jax.ShapeDtypeStruct((N, Cout, S), jnp.float32)]
    out_specs = [pl.BlockSpec((1, Cout, ts), lambda n, j: (n, 0, j))]
    if with_stats:
        stat_shape = jax.ShapeDtypeStruct((N, n_s, Cout, 1), jnp.float32)
        stat_spec = pl.BlockSpec((1, 1, Cout, 1), lambda n, j: (n, j, 0, 0))
        out_shape += [stat_shape, stat_shape]
        out_specs += [stat_spec, stat_spec]

    res = pl.pallas_call(
        _fused_bn_relu_conv_kernel,
        out_shape=tuple(out_shape),
        grid_spec=pltpu.PrefetchScalarGridSpec(
            num_scalar_prefetch=0,
            grid=(N, n_s),
            in_specs=in_specs,
            out_specs=tuple(out_specs),
        ),
        compiler_params=pltpu.CompilerParams(
            dimension_semantics=("parallel", "parallel")),
    )(
        x3,
        scale.reshape(K, 1),
        shift.reshape(K, 1),
        w.reshape(Cout, K),
        b.reshape(Cout, 1),
    )
    return res if with_stats else res[0]


# ------------------------------ forward pass ------------------------------ #
def transition_layer_forward(x, params, target_lanes=16384):
    """x: (N, C, D, H, W) f32 (NCDHW). Returns (N, Cout, D//2, H//2, W//2)."""
    gamma, beta = params["gamma"], params["beta"]
    w1, b1, w2, b2 = params["w1"], params["b1"], params["w2"], params["b2"]
    N, C, D, H, W = x.shape
    Cout = w2.shape[0]
    assert D % 2 == 0 and H % 2 == 0 and W % 2 == 0, "spatial dims must be even"
    Do, Ho, Wo = D // 2, H // 2, W // 2
    S = D * H * W
    Mo = Do * Ho * Wo

    x3 = x.reshape(N, C, S)                       # free reshape, stays NCDHW

    # BN #1: training-mode batch statistics over (N, D, H, W) per channel.
    mean1 = jnp.mean(x3, axis=(0, 2))
    var1 = jnp.var(x3, axis=(0, 2))
    scale1 = gamma * lax.rsqrt(var1 + EPS)
    shift1 = beta - mean1 * scale1

    # Kernel 1: BN1 + ReLU + conv1 (1x1x1) + BN#2 partial statistics.
    w1m = w1.reshape(C, C)                        # (Cout=C, Cin=C)
    yf, ssum, ssq = fused_bn_relu_conv(
        x3, scale1, shift1, w1m, b1, with_stats=True, target_lanes=target_lanes)

    # BN #2 statistics from the fused partial sums (no re-read of yf).
    cnt = jnp.float32(N * S)
    mean2 = jnp.sum(ssum, axis=(0, 1)).reshape(C) / cnt
    ex2 = jnp.sum(ssq, axis=(0, 1)).reshape(C) / cnt
    var2 = jnp.maximum(ex2 - mean2 * mean2, 0.0)
    scale2 = gamma * lax.rsqrt(var2 + EPS)
    shift2 = beta - mean2 * scale2

    # Space-to-depth for the 2x2x2 stride-2 conv, kept channels-first so the
    # conv2 kernel stays lane-dense.
    # TODO(synk): fold this lone XLA transpose into kernel 1's output BlockSpec.
    y8 = yf.reshape(N, C, Do, 2, Ho, 2, Wo, 2)
    yp = jnp.transpose(y8, (0, 3, 5, 7, 1, 2, 4, 6)).reshape(N, 8 * C, Mo)

    # Kernel 2: BN2 + ReLU + conv2 as a (8C -> Cout) row contraction.
    w2m = jnp.transpose(w2, (0, 2, 3, 4, 1)).reshape(Cout, 8 * C)
    scale2p = jnp.tile(scale2, 8)                 # rows ordered (kd,kh,kw,ci)
    shift2p = jnp.tile(shift2, 8)
    z = fused_bn_relu_conv(yp, scale2p, shift2p, w2m, b2,
                           with_stats=False, target_lanes=target_lanes)
    return z.reshape(N, Cout, Do, Ho, Wo)         # already NCDHW, free reshape


# ------------------------- pure-JAX reference ------------------------------ #
def reference_forward(x, params):
    gamma, beta = params["gamma"], params["beta"]
    w1, b1, w2, b2 = params["w1"], params["b1"], params["w2"], params["b2"]

    def bn(v):
        m = jnp.mean(v, axis=(0, 2, 3, 4), keepdims=True)
        var = jnp.var(v, axis=(0, 2, 3, 4), keepdims=True)
        g = gamma.reshape(1, -1, 1, 1, 1)
        bb = beta.reshape(1, -1, 1, 1, 1)
        return (v - m) * lax.rsqrt(var + EPS) * g + bb

    h = jnp.maximum(bn(x), 0.0)
    dn1 = lax.conv_dimension_numbers(h.shape, w1.shape, ("NCDHW", "OIDHW", "NCDHW"))
    h = lax.conv_general_dilated(h, w1, (1, 1, 1), "VALID", dimension_numbers=dn1)
    h = h + b1.reshape(1, -1, 1, 1, 1)
    h = jnp.maximum(bn(h), 0.0)
    dn2 = lax.conv_dimension_numbers(h.shape, w2.shape, ("NCDHW", "OIDHW", "NCDHW"))
    h = lax.conv_general_dilated(h, w2, (2, 2, 2), "VALID", dimension_numbers=dn2)
    return h + b2.reshape(1, -1, 1, 1, 1)


# --------------------------------- main ------------------------------------ #
if __name__ == "__main__":
    in_channels = 4
    reduction = 0.5
    out_channels = int(in_channels * reduction)

    key = jax.random.PRNGKey(0)
    ks = jax.random.split(key, 7)
    params = {
        "gamma": jax.random.uniform(ks[0], (in_channels,), jnp.float32, 0.5, 1.5),
        "beta": jax.random.normal(ks[1], (in_channels,), jnp.float32) * 0.1,
        "w1": jax.random.normal(ks[2], (in_channels, in_channels, 1, 1, 1), jnp.float32)
              * (1.0 / np.sqrt(in_channels)),
        "b1": jax.random.normal(ks[3], (in_channels,), jnp.float32) * 0.1,
        "w2": jax.random.normal(ks[4], (out_channels, in_channels, 2, 2, 2), jnp.float32)
              * (1.0 / np.sqrt(8 * in_channels)),
        "b2": jax.random.normal(ks[5], (out_channels,), jnp.float32) * 0.1,
    }

    # x: (N=2, C=4, D=4, H=8, W=8)  -> 512 input voxels, 64 output voxels.
    x = jax.random.normal(ks[6], (2, in_channels, 4, 8, 8), jnp.float32)

    out = transition_layer_forward(x, params)
    jax.block_until_ready(out)

    ref = reference_forward(x, params)
    np.testing.assert_allclose(np.asarray(out), np.asarray(ref), atol=1e-4, rtol=1e-4)
    assert out.shape == (2, out_channels, 2, 4, 4)
    print("KERNEL_OK")
</pallas_src>

<mosaic_0001>
module attributes {stable_mosaic.version = 11 : i64} {
  func.func @_fused_bn_relu_conv_kernel(%arg0: i32, %arg1: i32, %arg2: memref<1x4x256xf32, #tpu.memory_space<vmem>>, %arg3: memref<4x1xf32, #tpu.memory_space<vmem>>, %arg4: memref<4x1xf32, #tpu.memory_space<vmem>>, %arg5: memref<4x4xf32, #tpu.memory_space<vmem>>, %arg6: memref<4x1xf32, #tpu.memory_space<vmem>>, %arg7: memref<1x4x256xf32, #tpu.memory_space<vmem>>, %arg8: memref<1x1x4x1xf32, #tpu.memory_space<vmem>>, %arg9: memref<1x1x4x1xf32, #tpu.memory_space<vmem>>) attributes {dimension_semantics = [#tpu.dimension_semantics<parallel>, #tpu.dimension_semantics<parallel>], iteration_bounds = array<i64: 2, 1>, scalar_prefetch = 0 : i64, scratch_operands = 0 : i64, tpu.core_type = #tpu.core_type<tc>, window_params = [{transform_indices = @transform_0, window_bounds = array<i64: 1, 4, 256>}, {pipeline_mode = #tpu.pipeline_mode<synchronous>, transform_indices = @transform_1, window_bounds = array<i64: 4, 1>}, {pipeline_mode = #tpu.pipeline_mode<synchronous>, transform_indices = @transform_2, window_bounds = array<i64: 4, 1>}, {pipeline_mode = #tpu.pipeline_mode<synchronous>, transform_indices = @transform_3, window_bounds = array<i64: 4, 4>}, {pipeline_mode = #tpu.pipeline_mode<synchronous>, transform_indices = @transform_4, window_bounds = array<i64: 4, 1>}, {transform_indices = @transform_5, window_bounds = array<i64: 1, 4, 256>}, {transform_indices = @transform_6, window_bounds = array<i64: 1, 1, 4, 1>}, {transform_indices = @transform_7, window_bounds = array<i64: 1, 1, 4, 1>}]} {
    %c0 = arith.constant 0 : index
    %c0_0 = arith.constant 0 : index
    %c0_1 = arith.constant 0 : index
    %0 = vector.load %arg2[%c0, %c0_0, %c0_1] : memref<1x4x256xf32, #tpu.memory_space<vmem>>, vector<1x4x256xf32>
    %1 = vector.shape_cast %0 : vector<1x4x256xf32> to vector<4x256xf32>
    %c0_2 = arith.constant 0 : index
    %c0_3 = arith.constant 0 : index
    %2 = vector.load %arg3[%c0_2, %c0_3] : memref<4x1xf32, #tpu.memory_space<vmem>>, vector<4x1xf32>
    %3 = vector.broadcast %2 : vector<4x1xf32> to vector<4x256xf32>
    %4 = arith.mulf %1, %3 : vector<4x256xf32>
    %c0_4 = arith.constant 0 : index
    %c0_5 = arith.constant 0 : index
    %5 = vector.load %arg4[%c0_4, %c0_5] : memref<4x1xf32, #tpu.memory_space<vmem>>, vector<4x1xf32>
    %6 = vector.broadcast %5 : vector<4x1xf32> to vector<4x256xf32>
    %7 = arith.addf %4, %6 : vector<4x256xf32>
    %cst = arith.constant 0.000000e+00 : f32
    %8 = vector.broadcast %cst : f32 to vector<4x256xf32>
    %9 = arith.maximumf %7, %8 : vector<4x256xf32>
    %c0_6 = arith.constant 0 : index
    %c0_7 = arith.constant 0 : index
    %10 = vector.load %arg5[%c0_6, %c0_7] : memref<4x4xf32, #tpu.memory_space<vmem>>, vector<4x4xf32>
    %c0_8 = arith.constant 0 : index
    %c0_9 = arith.constant 0 : index
    %11 = vector.load %arg6[%c0_8, %c0_9] : memref<4x1xf32, #tpu.memory_space<vmem>>, vector<4x1xf32>
    %12 = vector.extract_strided_slice %10 {offsets = [0, 0], sizes = [4, 1], strides = [1, 1]} : vector<4x4xf32> to vector<4x1xf32>
    %13 = vector.extract_strided_slice %9 {offsets = [0, 0], sizes = [1, 256], strides = [1, 1]} : vector<4x256xf32> to vector<1x256xf32>
    %14 = vector.broadcast %12 : vector<4x1xf32> to vector<4x256xf32>
    %15 = vector.broadcast %13 : vector<1x256xf32> to vector<4x256xf32>
    %16 = arith.mulf %14, %15 : vector<4x256xf32>
    %17 = vector.broadcast %11 : vector<4x1xf32> to vector<4x256xf32>
    %18 = arith.addf %17, %16 : vector<4x256xf32>
    %19 = vector.extract_strided_slice %10 {offsets = [0, 1], sizes = [4, 1], strides = [1, 1]} : vector<4x4xf32> to vector<4x1xf32>
    %20 = vector.extract_strided_slice %9 {offsets = [1, 0], sizes = [1, 256], strides = [1, 1]} : vector<4x256xf32> to vector<1x256xf32>
    %21 = vector.broadcast %19 : vector<4x1xf32> to vector<4x256xf32>
    %22 = vector.broadcast %20 : vector<1x256xf32> to vector<4x256xf32>
    %23 = arith.mulf %21, %22 : vector<4x256xf32>
    %24 = arith.addf %18, %23 : vector<4x256xf32>
    %25 = vector.extract_strided_slice %10 {offsets = [0, 2], sizes = [4, 1], strides = [1, 1]} : vector<4x4xf32> to vector<4x1xf32>
    %26 = vector.extract_strided_slice %9 {offsets = [2, 0], sizes = [1, 256], strides = [1, 1]} : vector<4x256xf32> to vector<1x256xf32>
    %27 = vector.broadcast %25 : vector<4x1xf32> to vector<4x256xf32>
    %28 = vector.broadcast %26 : vector<1x256xf32> to vector<4x256xf32>
    %29 = arith.mulf %27, %28 : vector<4x256xf32>
    %30 = arith.addf %24, %29 : vector<4x256xf32>
    %31 = vector.extract_strided_slice %10 {offsets = [0, 3], sizes = [4, 1], strides = [1, 1]} : vector<4x4xf32> to vector<4x1xf32>
    %32 = vector.extract_strided_slice %9 {offsets = [3, 0], sizes = [1, 256], strides = [1, 1]} : vector<4x256xf32> to vector<1x256xf32>
    %33 = vector.broadcast %31 : vector<4x1xf32> to vector<4x256xf32>
    %34 = vector.broadcast %32 : vector<1x256xf32> to vector<4x256xf32>
    %35 = arith.mulf %33, %34 : vector<4x256xf32>
    %36 = arith.addf %30, %35 : vector<4x256xf32>
    %c0_10 = arith.constant 0 : index
    %c0_11 = arith.constant 0 : index
    %c0_12 = arith.constant 0 : index
    %37 = vector.load %arg7[%c0_10, %c0_11, %c0_12] : memref<1x4x256xf32, #tpu.memory_space<vmem>>, vector<1x4x256xf32>
    %38 = vector.shape_cast %37 : vector<1x4x256xf32> to vector<4x256xf32>
    %39 = vector.shape_cast %36 : vector<4x256xf32> to vector<1x4x256xf32>
    tpu.vector_store %arg7[%c0_10, %c0_11, %c0_12], %39 {strides = array<i32>} : memref<1x4x256xf32, #tpu.memory_space<vmem>>, vector<1x4x256xf32>,
    %cst_13 = arith.constant dense<0.000000e+00> : vector<4xf32>
    %40 = vector.multi_reduction <add>, %36, %cst_13 [1] : vector<4x256xf32> to vector<4xf32>
    %41 = vector.shape_cast %40 : vector<4xf32> to vector<4x1xf32>
    %c0_14 = arith.constant 0 : index
    %c0_15 = arith.constant 0 : index
    %c0_16 = arith.constant 0 : index
    %c0_17 = arith.constant 0 : index
    %42 = vector.load %arg8[%c0_14, %c0_15, %c0_16, %c0_17] : memref<1x1x4x1xf32, #tpu.memory_space<vmem>>, vector<1x1x4x1xf32>
    %43 = vector.shape_cast %42 : vector<1x1x4x1xf32> to vector<4x1xf32>
    %44 = vector.shape_cast %41 : vector<4x1xf32> to vector<1x1x4x1xf32>
    tpu.vector_store %arg8[%c0_14, %c0_15, %c0_16, %c0_17], %44 {strides = array<i32>} : memref<1x1x4x1xf32, #tpu.memory_space<vmem>>, vector<1x1x4x1xf32>,
    %45 = arith.mulf %36, %36 : vector<4x256xf32>
    %cst_18 = arith.constant dense<0.000000e+00> : vector<4xf32>
    %46 = vector.multi_reduction <add>, %45, %cst_18 [1] : vector<4x256xf32> to vector<4xf32>
    %47 = vector.shape_cast %46 : vector<4xf32> to vector<4x1xf32>
    %c0_19 = arith.constant 0 : index
    %c0_20 = arith.constant 0 : index
    %c0_21 = arith.constant 0 : index
    %c0_22 = arith.constant 0 : index
    %48 = vector.load %arg9[%c0_19, %c0_20, %c0_21, %c0_22] : memref<1x1x4x1xf32, #tpu.memory_space<vmem>>, vector<1x1x4x1xf32>
    %49 = vector.shape_cast %48 : vector<1x1x4x1xf32> to vector<4x1xf32>
    %50 = vector.shape_cast %47 : vector<4x1xf32> to vector<1x1x4x1xf32>
    tpu.vector_store %arg9[%c0_19, %c0_20, %c0_21, %c0_22], %50 {strides = array<i32>} : memref<1x1x4x1xf32, #tpu.memory_space<vmem>>, vector<1x1x4x1xf32>,
    return
  }
  func.func @transform_0(%arg0: i32, %arg1: i32) -> (i32, i32, i32) {
    %c0_i32 = arith.constant 0 : i32
    %c0_i32_0 = arith.constant 0 : i32
    return %arg0, %c0_i32, %arg1 : i32, i32, i32
  }
  func.func @transform_1(%arg0: i32, %arg1: i32) -> (i32, i32) {
    %c0_i32 = arith.constant 0 : i32
    %c0_i32_0 = arith.constant 0 : i32
    %c0_i32_1 = arith.constant 0 : i32
    return %c0_i32, %c0_i32_0 : i32, i32
  }
  func.func @transform_2(%arg0: i32, %arg1: i32) -> (i32, i32) {
    %c0_i32 = arith.constant 0 : i32
    %c0_i32_0 = arith.constant 0 : i32
    %c0_i32_1 = arith.constant 0 : i32
    return %c0_i32, %c0_i32_0 : i32, i32
  }
  func.func @transform_3(%arg0: i32, %arg1: i32) -> (i32, i32) {
    %c0_i32 = arith.constant 0 : i32
    %c0_i32_0 = arith.constant 0 : i32
    %c0_i32_1 = arith.constant 0 : i32
    return %c0_i32, %c0_i32_0 : i32, i32
  }
  func.func @transform_4(%arg0: i32, %arg1: i32) -> (i32, i32) {
    %c0_i32 = arith.constant 0 : i32
    %c0_i32_0 = arith.constant 0 : i32
    %c0_i32_1 = arith.constant 0 : i32
    return %c0_i32, %c0_i32_0 : i32, i32
  }
  func.func @transform_5(%arg0: i32, %arg1: i32) -> (i32, i32, i32) {
    %c0_i32 = arith.constant 0 : i32
    %c0_i32_0 = arith.constant 0 : i32
    return %arg0, %c0_i32, %arg1 : i32, i32, i32
  }
  func.func @transform_6(%arg0: i32, %arg1: i32) -> (i32, i32, i32, i32) {
    %c0_i32 = arith.constant 0 : i32
    %c0_i32_0 = arith.constant 0 : i32
    %c0_i32_1 = arith.constant 0 : i32
    return %arg0, %arg1, %c0_i32, %c0_i32_0 : i32, i32, i32, i32
  }
  func.func @transform_7(%arg0: i32, %arg1: i32) -> (i32, i32, i32, i32) {
    %c0_i32 = arith.constant 0 : i32
    %c0_i32_0 = arith.constant 0 : i32
    %c0_i32_1 = arith.constant 0 : i32
    return %arg0, %arg1, %c0_i32, %c0_i32_0 : i32, i32, i32, i32
  }
}

</mosaic_0001>

<bundles_post_ra>
// kernel: tpu_custom_call.1
= control target key start
LH: loop header
LB: loop body
LE: loop exit
PB: predicated region body
PF: predicated region fallthrough
CT: control target
= control target key end

     0   :  { %13 = vsyncpa [#allocation3], 0  ;;  %s1109_s0 = inlined_call_operand.hbm [shape: f32[2,4,256], index: 0, kind: input, shape index: {}]   ;;  %s1110_s1 = inlined_call_operand.vmem [shape: f32[4,1], index: 1, kind: input, shape index: {}]   ;;  %s1111_s2 = inlined_call_operand.vmem [shape: f32[4,1], index: 2, kind: input, shape index: {}]   ;;  %s1112_s3 = inlined_call_operand.vmem [shape: f32[4,4], index: 3, kind: input, shape index: {}]   ;;  %s1113_s4 = inlined_call_operand.vmem [shape: f32[4,1], index: 4, kind: input, shape index: {}]   ;;  %s1114_s5 = inlined_call_operand.hbm [shape: f32[2,4,256], index: 5, kind: output, shape index: {0}]   ;;  %s1115_s6 = inlined_call_operand.vmem [shape: f32[2,1,4,1], index: 6, kind: output, shape index: {1}]   ;;  %s1116_s7 = inlined_call_operand.vmem [shape: f32[2,1,4,1], index: 7, kind: output, shape index: {2}]  }
   0x1   :  { %15 = vsyncpa [#allocation3 + $0x1], 0 }
   0x2   :  { %16 = vsyncpa [#allocation4], 0 }
   0x3   :  { %18 = vsyncpa [#allocation4 + $0x1], 0  ;;  %s948_s24 = smov 0   ;;  %s950_s25 = smov 0  }
   0x4   :  { %s952_s26 = smov 0   ;;  %s954_s27 = smov 0  }
   0x5   :  { %s956_s28 = smov 0   ;;  %s958_s29 = smov 0  }
   0x6 LB: > { %s699_s30 = sadd.s32 4294967295, %s899_s29   ;;  %s700_s8 = sadd.s32 4294967294, %s899_s29   ;;  %s899_s29 = sphi %s958_s29, %s24_s29   ;;  %s895_s28 = sphi %s956_s28, %s1128_s28   ;;  %s891_s27 = sphi %s954_s27, %s1127_s27   ;;  %s887_s26 = sphi %s952_s26, %s1126_s26   ;;  %s883_s25 = sphi %s950_s25, %s1125_s25   ;;  %s879_s24 = sphi %s948_s24, %s1124_s24  }
   0x7   : > { %s36_s9 = sadd.s32 1, %s895_s28  ;;  %s45_s10 = sadd.s32 1, %s887_s26 }
   0x8   : > { %p38_p0 = scmp.ge.s32.totalorder %s36_s9, 2  ;;  %p52_p1 = scmp.ne.s32.totalorder %s887_s26, %s883_s25 }
   0x9   : > { %p53_p2 = scmp.eq.s32.totalorder %s899_s29, 0  ;;  %p58_p3 = scmp.ne.s32.totalorder %s883_s25, %s879_s24 }
   0xa   : > { %s1130_s9 = smov (%p38_p0, %s36_s9), 0  ;;  %p59_p5 = scmp.eq.s32.totalorder %s699_s30, 0 }
   0xb   : > { %p989_p4 = por %p53_p2, %p52_p1  ;;  %s40_s12 = ssub.s32 %s895_s28, %s1130_s9 }
   0xc   : > { %p168_p6 = scmp.eq.s32.totalorder %s699_s30, 1  ;;  %p43_p7 = scmp.eq.s32.totalorder %s40_s12, 0 }
   0xd   : > { %p995_p8 = por %p59_p5, %p58_p3  ;;  %p174_p10 = scmp.eq.s32.totalorder %s700_s8, 1 }
   0xe   : > { %p999_p9 = por %p168_p6, %p52_p1  ;;  %p730_p13 = scmp.lt.s32.totalorder %s899_s29, 2 }
   0xf   : > { %s1004_s15 = scalar_select %p43_p7, %s887_s26, %s45_s10  }
  0x10   : > { %p1006_p11 = por %p174_p10, %p58_p3  ;;  %s262_s17 = sand.u32 1, %s887_s26  }
  0x11   : > { %s703_s18 = sshll.u32 %s262_s17, 3  ;;  %s716_s19 = sshll.u32 %s895_s28, 7 }
  0x12   : > { %s1120_s16 = scalar_select %p1006_p11, 1, 0 }
  0x13   : > { %s274_s22 = scalar_lea.hbm %s1109_s0, %s716_s19  ;;  %s266_s23 = scalar_lea.vmem [#allocation2], %s703_s18 }
  0x14   : > { %s276_s30 = sshll.u32 %s266_s23, 4  ;;  %p1019_p0 = pnand %p730_p13, %p989_p4  ;;  %s277_s30 = int_to_ptr.vmem [resolvable:$true] %s276_s30 }
  0x15   : > { %p706_p1 = scmp.ge.s32.totalorder %s899_s29, 1  ;;  %p281_p2 = scmp.lt.s32.totalorder %s899_s29, 3 }
  0x16   : > { %s263_s10 = scalar_lea.sflag [#allocation3], %s262_s17  ;;  %p793_p3 = pneg %p1019_p0 }
  0x17   : > { %s804_s12 = scalar_lea.vmem %s277_s30, 128  ;;  %s901_s20 = smov [#allocation2]  }
  0x18   : > { %p805_p5 = scmp.ne.s32.totalorder %s277_s30, %s804_s12  ;;  %s809_s19 = sshll.u32 %s901_s20, 4  ;;  %s810_s19 = int_to_ptr.vmem [resolvable:$false] %s809_s19 }
  0x19   : > { %s811_s18 = scalar_lea.vmem %s810_s19, 256  ;;  %p812_p10 = scmp.lt.s32.totalorder %s277_s30, %s810_s19 }
  0x1a   : > { %p807_p6 = pnand %p805_p5, %p793_p3  ;;  %p813_p12 = scmp.lt.s32.totalorder %s811_s18, %s804_s12 }
  0x1c   : > { %p808_p7 = pneg %p807_p6  ;;  %p814_p4 = por %p813_p12, %p812_p10 }
  0x1e   : > { %p815_p13 = pnand %p814_p4, %p808_p7 }
  0x20   : > { %818 = shalt.err (!%p815_p13)
}
  0x21   : > { %725 = dma.hbm_to_vmem [thread:$0]  (!%p1019_p0), %s274_s22, 128, %s277_s30, %s263_s10  }
  0x22   : > { %p282_p11 = pnand %p706_p1, %p281_p2 }
  0x23   : > { %s1034_s11 = sand.u32 (!%p282_p11), 1, %s883_s25  }
  0x24   : > { %285 = sbr.rel (%p282_p11) target bundleno = 336 (0x150), region = 40  ;;  %s707_s17 = sshll.u32 (!%p282_p11), %s1034_s11, 3 }
  0x25   : > { %s288_s21 = scalar_lea.sflag (!%p282_p11), [#allocation3], %s1034_s11  ;;  %s1040_s23 = scalar_lea.vmem (!%p282_p11), [#allocation2], %s707_s17 }
  0x29   : > { %870 = dma.done.wait (%p995_p8), %s288_s21, 128  }
  0x2a   : > { %872 = vsyncadd (%p995_p8), %s288_s21, 4294967168  ;;  %v902_v0 = vmov 0   ;;  %v382_v1 = vld [vmem:[%s1112_s3] sm:$0xf]  ;;  %v903_v5 = vmov 2   ;;  %v904_v6 = vmov 1   ;;  %v361_v10 = vlaneseq }
  0x2b   : > { %786 = vset.pattern.permute.xlu1 %v902_v0  ;;  %785 = vset.pattern.permute.xlu0 %v902_v0  ;;  %v353_v2 = vld [vmem:[%s1110_s1] sm:$0xf]  ;;  %v905_v7 = vmov 3   ;;  %v906_v8 = vmov 839922192   ;;  %vm500_vm0 = vcmask 1043456  }
  0x2c   : > { %386 = vperm.xlu1 %786, %v382_v1   ;;  %356 = vperm.xlu0 %785, %v353_v2   ;;  %v383_v3 = vld [vmem:[%s1113_s4] sm:$0xf]  ;;  %v359_v9 = vunpack.c.l.s4 %v906_v8  ;;  %v362_v12 = vshrl.u32 %v361_v10, 7  ;;  %s317_s18 = scalar_lea.vmem [#allocation5], %s707_s17  ;;  %s717_s21 = sshll.u32 %s891_s27, 7 }
  0x2d   : > { %v367_v4 = vld [vmem:[%s1111_s2] sm:$0xf]  ;;  %s545_s8 = scalar_lea.hbm %s1114_s5, %s717_s21  ;;  %s517_s10 = scalar_lea.sflag [#allocation4], %s1034_s11 }
  0x2e   : > { %v360_v11 = vunpack.c.0.s8 %v359_v9  ;;  %v352_v17 = vld [vmem:[%s1040_s23] sm:$0xff]  ;;  %v392_v21 = vsub.s32 0, %v362_v12  ;;  %v396_v24 = vsub.s32 4, %v362_v12  ;;  %v449_v25 = vsub.s32 2, %v362_v12  ;;  %s547_s23 = sshll.u32 %s317_s18, 4  ;;  %s907_s20 = smov [#allocation5]   ;;  %s548_s23 = int_to_ptr.vmem [resolvable:$true] %s547_s23 }
  0x2f   : > { %v453_v26 = vsub.s32 6, %v362_v12  ;;  %v475_v27 = vsub.s32 3, %v362_v12  ;;  %v479_v28 = vsub.s32 7, %v362_v12  ;;  %v423_v29 = vsub.s32 1, %v362_v12  ;;  %s819_s12 = scalar_lea.vmem %s548_s23, 128  ;;  %s823_s19 = sshll.u32 %s907_s20, 4  ;;  %s824_s19 = int_to_ptr.vmem [resolvable:$false] %s823_s19 }
  0x30   : > { %412 = vperm.xlu1 %786, %v383_v3   ;;  %370 = vperm.xlu0 %785, %v367_v4   ;;  %v363_v13 = vsub.s32 %v360_v11, %v362_v12  ;;  %v427_v30 = vsub.s32 5, %v362_v12  ;;  %p820_p8 = scmp.ne.s32.totalorder %s548_s23, %s819_s12  ;;  %s825_s13 = scalar_lea.vmem %s824_s19, 256 }
  0x31   : > { %p826_p0 = scmp.lt.s32.totalorder %s548_s23, %s824_s19  ;;  %p827_p1 = scmp.lt.s32.totalorder %s825_s13, %s819_s12 }
  0x32   : > { %p821_p11 = pnand %p820_p8, %p999_p9 }
  0x33   : > { %p828_p2 = por %p827_p1, %p826_p0 }
  0x34   : > { %788 = vset.pattern.permute.xlu1 %v903_v5  ;;  %787 = vset.pattern.permute.xlu0 %v904_v6  ;;  %p822_p12 = pneg %p821_p11 }
  0x35   : > { %444 = vperm.xlu1 %788, %v382_v1   ;;  %418 = vperm.xlu0 %787, %v382_v1  }
  0x36   : > { %p829_p3 = pnand %p828_p2, %p822_p12 }
  0x39   : > { %789 = vset.pattern.permute.xlu1 %v905_v7  ;;  %790 = vset.pattern.permute.xlu0 %v905_v7 }
  0x3a   : > { %470 = vperm.xlu1 %789, %v382_v1  }
  0xa7   : > { %v357_v14 = vpop.permute.xlu0 %356  ;;  %v387_v15 = vpop.permute.xlu1 %386 }
  0xa8   : > { %v364_v16 = vrot.slane %v357_v14, %v363_v13 }
  0xaa   : > { %v366_v19 = vmul.f32 %v364_v16, %v352_v17 }
  0xab   : > { %v371_v18 = vpop.permute.xlu0 %370  ;;  %v413_v22 = vpop.permute.xlu1 %412 }
  0xac   : > { %v378_v20 = vrot.slane %v371_v18, %v363_v13 }
  0xae   : > { %v380_v23 = vadd.f32 %v378_v20, %v366_v19 }
  0xb0   : > { %v381_v31 = vmax.f32 %v380_v23, 0.0  ;;  %v445_v36 = vpop.permute.xlu1 %444  ;;  %v419_v43 = vpop.permute.xlu0 %418 }
  0xb2   : > { %v393_v32 = vrot.slane %v381_v31, %v392_v21  ;;  %v397_v33 = vrot.slane %v381_v31, %v396_v24  ;;  %v450_v34 = vrot.slane %v381_v31, %v449_v25  ;;  %v454_v35 = vrot.slane %v381_v31, %v453_v26 }
  0xb3   : > { %v476_v37 = vrot.slane %v381_v31, %v475_v27  ;;  %v480_v38 = vrot.slane %v381_v31, %v479_v28  ;;  %v424_v39 = vrot.slane %v381_v31, %v423_v29  ;;  %v428_v40 = vrot.slane %v381_v31, %v427_v30 }
  0xb4   : > { %v403_v41 = vrot.slane %v393_v32, %v392_v21  ;;  %v407_v42 = vrot.slane %v397_v33, %v392_v21  ;;  %v460_v48 = vrot.slane %v450_v34, %v449_v25  ;;  %v464_v49 = vrot.slane %v454_v35, %v449_v25 }
  0xb5   : > { %v434_v44 = vrot.slane %v424_v39, %v423_v29  ;;  %v438_v45 = vrot.slane %v428_v40, %v423_v29  ;;  %v486_v50 = vrot.slane %v476_v37, %v475_v27  ;;  %v490_v51 = vrot.slane %v480_v38, %v475_v27  ;;  %v471_v56 = vpop.permute.xlu1 %470 }
  0xb6   : > { %v408_v46 = vmul.f32 %v403_v41, %v387_v15  ;;  %v409_v47 = vmul.f32 %v407_v42, %v387_v15  ;;  %v465_v57 = vmul.f32 %v460_v48, %v445_v36  ;;  %v466_v58 = vmul.f32 %v464_v49, %v445_v36 }
  0xb7   : > { %v439_v54 = vmul.f32 %v434_v44, %v419_v43  ;;  %v440_v55 = vmul.f32 %v438_v45, %v419_v43  ;;  %v491_v61 = vmul.f32 %v486_v50, %v471_v56  ;;  %v492_v62 = vmul.f32 %v490_v51, %v471_v56 }
  0xb8   : > { %v415_v52 = vadd.f32 %v413_v22, %v408_v46  ;;  %v416_v53 = vadd.f32 %v413_v22, %v409_v47 }
  0xba   : > { %v441_v59 = vadd.f32 %v439_v54, %v415_v52  ;;  %v442_v60 = vadd.f32 %v440_v55, %v416_v53 }
  0xbc   : > { %v467_v63 = vadd.f32 %v465_v57, %v441_v59  ;;  %v468_v0 = vadd.f32 %v466_v58, %v442_v60 }
  0xbe   : > { %v493_v1 = vadd.f32 %v491_v61, %v467_v63  ;;  %v494_v2 = vadd.f32 %v492_v62, %v468_v0 }
  0xc0   : > { %v501_v3 = vsel %vm500_vm0, %v493_v1, 0.0  ;;  %v502_v4 = vsel %vm500_vm0, %v494_v2, 0.0  ;;  %v508_v5 = vmul.f32 %v493_v1, %v493_v1  ;;  %v509_v6 = vmul.f32 %v494_v2, %v494_v2 }
  0xc1   : > { %v503_v7 = vadd.f32 %v502_v4, %v501_v3  ;;  %v497_v8 = vcombine.low %v493_v1, %v494_v2 }
  0xc2   : > { %v510_v9 = vsel %vm500_vm0, %v508_v5, 0.0  ;;  %v511_v10 = vsel %vm500_vm0, %v509_v6, 0.0 }
  0xc3   : > { %504 = vadd.xlane.f32.xlu0 %v503_v7  ;;  %v512_v11 = vadd.f32 %v511_v10, %v510_v9  ;;  %499 = vst [vmem:[%s317_s18] sm:$0xff] %v497_v8 }
  0xc5   : > { %513 = vadd.xlane.f32.xlu1 %v512_v11 }
  0xc6   : > { %832 = shalt.err (!%p829_p3)
}
  0xc7   : > { %s833_s17 = scalar_lea.hbm %s545_s8, 128  ;;  %s837_s21 = scalar_lea.hbm %s1114_s5, 256 }
  0xc8   : > { %p834_p5 = scmp.ne.s32.totalorder %s545_s8, %s833_s17  ;;  %p838_p10 = scmp.lt.s32.totalorder %s545_s8, %s1114_s5 }
  0xc9   : > { %p839_p4 = scmp.lt.s32.totalorder %s837_s21, %s833_s17 }
  0xca   : > { %p835_p6 = pnand %p834_p5, %p999_p9 }
  0xcb   : > { %p840_p13 = por %p839_p4, %p838_p10 }
  0xcc   : > { %p836_p7 = pneg %p835_p6 }
  0xce   : > { %p841_p8 = pnand %p840_p13, %p836_p7 }
  0xd0   : > { %844 = shalt.err (!%p841_p8)
}
  0xd1   : > { %720 = dma.vmem_to_hbm [thread:$0]  (%p999_p9), %s548_s23, 128, %s545_s8, %s517_s10   ;;  %vm506_vm1 = vcmask 3072  }
  0xd2   : > { %p338_p11 = scmp.lt.s32.totalorder %s891_s27, 1 }
  0xd4   : > { %s1132_s27 = smov (!%p338_p11, %s891_s27), 1 }
  0xd5   : > { %s709_s12 = sshll.u32 %s1132_s27, 2 }
  0xd6   : > { %s344_s13 = scalar_lea.vmem %s1115_s6, %s709_s12  ;;  %s351_s17 = scalar_lea.vmem %s1116_s7, %s709_s12 }
 0x14c   : > { %v505_v12 = vpop.xlane.xlu0 %504 }
 0x14d   : > { %507 = vst.msk [vmem:[%s344_s13] sm:$0xf] %vm506_vm1, %v505_v12 }
 0x14e   : > { %v514_v13 = vpop.xlane.xlu1 %513 }
 0x14f   : > { %515 = vst.msk [vmem:[%s351_s17] sm:$0xf] %vm506_vm1, %v514_v13 }
 0x150 PF: > { %s565_s14 = sand.u32 1, %s879_s24   ;;  %p1122_p9 = scmp.ne.s32.totalorder %s1120_s16, 0 }
 0x151   : > { %p1123_p12 = scmp.ge.s32.totalorder %s899_s29, 2  ;;  %s566_s27 = scalar_lea.sflag [#allocation4], %s565_s14 }
 0x153   : > { %p727_p0 = pnand %p1123_p12, %p1122_p9 }
 0x155   : > { %p728_p1 = pneg %p727_p0 }
 0x157   : > { %874 = dma.done.wait (%p728_p1), %s566_s27, 128  }
 0x158   : > { %876 = vsyncadd (%p728_p1), %s566_s27, 4294967168  ;;  %s24_s29 = sadd.s32 1, %s899_s29   ;;  %s1124_s24 = smov %s883_s25 }
 0x159   : > { %p21_p2 = scmp.ge.s32.totalorder %s24_s29, 4   ;;  %s1125_s25 = smov %s887_s26 }
 0x15a   : > { %s1126_s26 = smov %s1004_s15  ;;  %s1127_s27 = smov %s895_s28 }
 0x15b   : > { %s1128_s28 = smov %s1130_s9  ;;  %23 = sbr.rel (!%p21_p2) target bundleno = 6 (0x6), region = 109 }
 0x160   :  { %591 = vsyncpa [#allocation3], 1 }
 0x161   :  { %593 = vsyncpa [#allocation3 + $0x1], 1 }
 0x162   :  { %594 = vsyncpa [#allocation4], 1 }
 0x163   :  { %596 = vsyncpa [#allocation4 + $0x1], 1 }

</bundles_post_ra>
